<compile_context>
chip_gen: v6e
topology: v6e:2x2x1
jax: 0.10.0
libtpu: 0.0.40
codegen_flags: <defaults>
</compile_context>

<pallas_src>
import functools

import jax
import jax.numpy as jnp
from jax import lax
from jax.experimental import pallas as pl
from jax.experimental.pallas import tpu as pltpu


def _self_attention_kernel(heads, head_dim, fuse_out,
                           v_ref, k_ref, q_ref,
                           wv_ref, bv_ref,
                           wk_ref, bk_ref,
                           wq_ref, bq_ref,
                           wo_ref, bo_ref,
                           o_ref,
                           *scratch):
    if fuse_out:
        k_sc, v_sc, ho_sc = scratch
    else:
        k_sc, v_sc = scratch

    # --- Project K/V once per batch.  The query-tile axis (grid axis 1) is
    # "arbitrary", so this scratch persists across query tiles of one batch;
    # tiles i > 0 just read the cached bf16 projections.
    @pl.when(pl.program_id(1) == 0)
    def _():
        k_in = k_ref[0]            # (Lk, E) bf16
        v_in = v_ref[0]            # (Lv, E) bf16
        K = jnp.dot(k_in, wk_ref[...], preferred_element_type=jnp.float32) + bk_ref[...]
        V = jnp.dot(v_in, wv_ref[...], preferred_element_type=jnp.float32) + bv_ref[...]
        k_sc[...] = K.astype(jnp.bfloat16)
        v_sc[...] = V.astype(jnp.bfloat16)

    # --- Query projection for this (batch, query-tile) block.
    q_in = q_ref[0]                # (TQ, E) bf16
    Q = jnp.dot(q_in, wq_ref[...], preferred_element_type=jnp.float32) + bq_ref[...]
    # 1/sqrt(embed_size) is already folded into wq/bq by the wrapper.
    Qb = Q.astype(jnp.bfloat16)
    Kb = k_sc[...]                 # (Lk, E) bf16
    Vb = v_sc[...]                 # (Lv, E) bf16
    wo = wo_ref[...]               # (E, E) bf16

    acc = None
    if not fuse_out:
        # f32 accumulator for the fc_out projection (per-head accumulation).
        acc = jnp.zeros(Q.shape, jnp.float32)     # (TQ, E)

    for h in range(heads):         # static loop over heads
        lo, hi = h * head_dim, (h + 1) * head_dim
        qh = Qb[:, lo:hi]          # (TQ, d)
        kh = Kb[:, lo:hi]          # (Lk, d)
        vh = Vb[:, lo:hi]          # (Lv, d)

        # scores = qh @ kh^T without materializing a transpose.
        scores = lax.dot_general(qh, kh, (((1,), (1,)), ((), ())),
                                 preferred_element_type=jnp.float32)   # (TQ, Lk)
        scores = scores - jnp.max(scores, axis=-1, keepdims=True)
        p = jnp.exp(scores)

        # Deferred softmax normalization: matmul with unnormalized p, then
        # scale the small (TQ, head_dim) result instead of the (TQ, Lk) probs.
        inv_l = pl.reciprocal(jnp.sum(p, axis=-1, keepdims=True), approx=False)
        head_out = jnp.dot(p.astype(jnp.bfloat16), vh,
                           preferred_element_type=jnp.float32) * inv_l  # (TQ, d)

        if fuse_out:
            # 128-aligned lane slice -> plain store, no relayout.
            ho_sc[:, lo:hi] = head_out.astype(jnp.bfloat16)
        else:
            # Accumulate the output projection per head.
            acc = acc + jnp.dot(head_out.astype(jnp.bfloat16), wo[lo:hi, :],
                                preferred_element_type=jnp.float32)

    if fuse_out:
        # Single full-contraction-depth fc_out matmul.
        acc = jnp.dot(ho_sc[...], wo, preferred_element_type=jnp.float32)

    o_ref[0] = (acc + bo_ref[...]).astype(o_ref.dtype)


def self_attention_pallas(values, keys, query, mask, params, *, heads):
    """Multi-head self-attention matching the PyTorch `SelfAttention.forward`.

    WARNING: `mask` is accepted but IGNORED, reproducing the original module,
    whose softmax is applied to the unmasked scores.
    """
    del mask
    N, Lq, E = query.shape
    _, Lk, _ = keys.shape
    _, Lv, _ = values.shape
    assert Lk == Lv, "self-attention assumes key_len == value_len"
    head_dim = E // heads
    assert head_dim * heads == E

    wv, bv, wk, bk, wq, bq, wo, bo = params
    out_dtype = query.dtype
    fuse_out = (head_dim % 128 == 0)   # lane-aligned head slabs -> single fc_out matmul

    # Fold the PyTorch 1/sqrt(embed_size) softmax scale into the query projection.
    scale = 1.0 / (float(E) ** 0.5)
    wq_s = wq.astype(jnp.float32) * scale
    bq_s = bq.astype(jnp.float32) * scale

    # bf16 MXU operands; f32 biases.
    to_bf16 = lambda x: x.astype(jnp.bfloat16)
    values_b, keys_b, query_b = to_bf16(values), to_bf16(keys), to_bf16(query)
    wv_b, wk_b, wq_b, wo_b = to_bf16(wv), to_bf16(wk), to_bf16(wq_s), to_bf16(wo)
    bv_f, bk_f, bo_f = (b.astype(jnp.float32) for b in (bv, bk, bo))
    bq_f = bq_s

    # VMEM capacity (v5e/v6e: 128 MiB, v7x: 64 MiB); conservative fallback = v7x.
    try:
        vmem_cap = int(pltpu.get_tpu_info().vmem_capacity_bytes)
    except Exception:  # pragma: no cover - info query unavailable
        vmem_cap = 64 * 1024 * 1024
    vmem_cap = int(vmem_cap * 0.9)     # leave headroom for compiler internals

    def footprint(tq):
        bf16, f32 = 2, 4
        # double-buffered input blocks + output block
        blocks = 2 * (Lv + Lk + tq) * E * bf16 + 2 * tq * E * out_dtype.itemsize
        # weights/biases (double-buffered by default)
        weights = 2 * 4 * E * E * bf16 + 2 * 4 * E * f32
        # persistent scratch: cached K/V projections (+ head-output slab if fused)
        scratch = 2 * Lk * E * bf16 + (tq * E * bf16 if fuse_out else 0)
        # in-kernel temporaries: f32 K/V (inside pl.when), f32 Q + bf16 Q,
        # bf16 K/V loads, per-head f32 scores + exp, head_out, f32 accumulator
        temps = (2 * Lk * E * f32 + tq * E * (f32 + bf16) + 2 * Lk * E * bf16
                 + 2 * tq * Lk * f32 + tq * head_dim * f32 + tq * E * f32)
        return blocks + weights + scratch + temps

    # VMEM-aware query-tile selection.
    TQ = Lq
    for cand in (512, 256, 128):
        if Lq % cand == 0 and int(1.3 * footprint(cand)) <= vmem_cap:
            TQ = cand
            break
    # TODO(synk): Lq not divisible by 128 falls back to TQ=Lq (full sequence);
    # for long odd-length sequences add padding or a BoundedSlice tail tile.

    grid = (N, Lq // TQ)
    vmem_limit = int(min(max(int(1.5 * footprint(TQ)), 32 * 1024 * 1024), vmem_cap))

    kernel = functools.partial(_self_attention_kernel, heads, head_dim, fuse_out)

    kv_spec = lambda L: pl.BlockSpec((1, L, E), lambda b, i: (b, 0, 0))
    q_spec = pl.BlockSpec((1, TQ, E), lambda b, i: (b, i, 0))
    w_spec = pl.BlockSpec((E, E), lambda b, i: (0, 0))
    b_spec = pl.BlockSpec((1, E), lambda b, i: (0, 0))
    out_spec = pl.BlockSpec((1, TQ, E), lambda b, i: (b, i, 0))

    scratch_shapes = [pltpu.VMEM((Lk, E), jnp.bfloat16),   # cached K projection
                      pltpu.VMEM((Lv, E), jnp.bfloat16)]   # cached V projection
    if fuse_out:
        scratch_shapes.append(pltpu.VMEM((TQ, E), jnp.bfloat16))  # head-output slab

    cost = pl.CostEstimate(
        flops=2 * N * E * E * (Lv + Lk + 2 * Lq) + 4 * N * Lq * Lk * E,
        transcendentals=N * heads * Lq * Lk,
        bytes_accessed=2 * N * E * (Lv + Lk + Lq) + 8 * E * E + 16 * E
                       + out_dtype.itemsize * N * Lq * E,
    )

    return pl.pallas_call(
        kernel,
        out_shape=jax.ShapeDtypeStruct((N, Lq, E), out_dtype),
        grid_spec=pltpu.PrefetchScalarGridSpec(
            num_scalar_prefetch=0,
            grid=grid,
            in_specs=[
                kv_spec(Lv), kv_spec(Lk), q_spec,
                w_spec, b_spec,   # values proj
                w_spec, b_spec,   # keys proj
                w_spec, b_spec,   # queries proj (pre-scaled)
                w_spec, b_spec,   # fc_out
            ],
            out_specs=out_spec,
            scratch_shapes=scratch_shapes,
        ),
        compiler_params=pltpu.CompilerParams(
            # batch axis parallel (megacore); query-tile axis arbitrary so the
            # cached K/V scratch is valid across query tiles of one batch.
            dimension_semantics=("parallel", "arbitrary"),
            vmem_limit_bytes=vmem_limit),
        cost_estimate=cost,
    )(values_b, keys_b, query_b,
      wv_b, bv_f, wk_b, bk_f, wq_b, bq_f, wo_b, bo_f)


def self_attention_ref(values, keys, query, mask, params, *, heads):
    """Pure-JAX f32 reference mirroring the PyTorch forward."""
    del mask  # unused in the original forward's softmax (see note at top).
    wv, bv, wk, bk, wq, bq, wo, bo = params
    N, Lq, E = query.shape
    head_dim = E // heads

    V = values @ wv + bv
    K = keys @ wk + bk
    Q = query @ wq + bq

    V = V.reshape(N, -1, heads, head_dim)
    K = K.reshape(N, -1, heads, head_dim)
    Q = Q.reshape(N, Lq, heads, head_dim)

    qk = jnp.einsum('blhd,bqhd->bhlq', Q, K)
    attn = jax.nn.softmax(qk / (E ** 0.5), axis=3)
    out = jnp.einsum('bhlq,bqhd->blhd', attn, V).reshape(N, Lq, E)
    return out @ wo + bo


if __name__ == "__main__":
    N, L, E, HEADS = 2, 8, 32, 4

    key = jax.random.PRNGKey(0)
    ks = jax.random.split(key, 12)

    values = jax.random.normal(ks[0], (N, L, E), jnp.float32)
    keys_ = jax.random.normal(ks[1], (N, L, E), jnp.float32)
    query = jax.random.normal(ks[2], (N, L, E), jnp.float32)
    mask = jnp.ones((N, 1, L, L), jnp.float32)   # accepted but has no effect

    def init_linear(kw, kb):
        bound = 1.0 / (E ** 0.5)
        w = jax.random.uniform(kw, (E, E), jnp.float32, -bound, bound)
        b = jax.random.uniform(kb, (1, E), jnp.float32, -bound, bound)
        return w, b

    wv, bv = init_linear(ks[3], ks[4])
    wk, bk = init_linear(ks[5], ks[6])
    wq, bq = init_linear(ks[7], ks[8])
    wo, bo = init_linear(ks[9], ks[10])
    params = (wv, bv, wk, bk, wq, bq, wo, bo)

    out = self_attention_pallas(values, keys_, query, mask, params, heads=HEADS)
    out = jax.block_until_ready(out)

    ref = self_attention_ref(values, keys_, query, mask, params, heads=HEADS)
    assert out.shape == (N, L, E)
    # bf16 MXU compute vs f32 reference -> looser tolerance.
    assert jnp.allclose(out, ref, atol=5e-2, rtol=5e-2), \
        f"max err {jnp.max(jnp.abs(out - ref))}"

    print("KERNEL_OK")
</pallas_src>

<mosaic_0001>
module attributes {stable_mosaic.version = 11 : i64} {
  func.func @_self_attention_kernel(%arg0: i32, %arg1: i32, %arg2: memref<1x8x32xbf16, #tpu.memory_space<vmem>>, %arg3: memref<1x8x32xbf16, #tpu.memory_space<vmem>>, %arg4: memref<1x8x32xbf16, #tpu.memory_space<vmem>>, %arg5: memref<32x32xbf16, #tpu.memory_space<vmem>>, %arg6: memref<1x32xf32, #tpu.memory_space<vmem>>, %arg7: memref<32x32xbf16, #tpu.memory_space<vmem>>, %arg8: memref<1x32xf32, #tpu.memory_space<vmem>>, %arg9: memref<32x32xbf16, #tpu.memory_space<vmem>>, %arg10: memref<1x32xf32, #tpu.memory_space<vmem>>, %arg11: memref<32x32xbf16, #tpu.memory_space<vmem>>, %arg12: memref<1x32xf32, #tpu.memory_space<vmem>>, %arg13: memref<1x8x32xf32, #tpu.memory_space<vmem>>, %arg14: memref<8x32xbf16, #tpu.memory_space<vmem>>, %arg15: memref<8x32xbf16, #tpu.memory_space<vmem>>) attributes {dimension_semantics = [#tpu.dimension_semantics<parallel>, #tpu.dimension_semantics<arbitrary>], iteration_bounds = array<i64: 2, 1>, scalar_prefetch = 0 : i64, scratch_operands = 2 : i64, tpu.core_type = #tpu.core_type<tc>, window_params = [{transform_indices = @transform_0, window_bounds = array<i64: 1, 8, 32>}, {transform_indices = @transform_1, window_bounds = array<i64: 1, 8, 32>}, {transform_indices = @transform_2, window_bounds = array<i64: 1, 8, 32>}, {pipeline_mode = #tpu.pipeline_mode<synchronous>, transform_indices = @transform_3, window_bounds = array<i64: 32, 32>}, {pipeline_mode = #tpu.pipeline_mode<synchronous>, transform_indices = @transform_4, window_bounds = array<i64: 1, 32>}, {pipeline_mode = #tpu.pipeline_mode<synchronous>, transform_indices = @transform_5, window_bounds = array<i64: 32, 32>}, {pipeline_mode = #tpu.pipeline_mode<synchronous>, transform_indices = @transform_6, window_bounds = array<i64: 1, 32>}, {pipeline_mode = #tpu.pipeline_mode<synchronous>, transform_indices = @transform_7, window_bounds = array<i64: 32, 32>}, {pipeline_mode = #tpu.pipeline_mode<synchronous>, transform_indices = @transform_8, window_bounds = array<i64: 1, 32>}, {pipeline_mode = #tpu.pipeline_mode<synchronous>, transform_indices = @transform_9, window_bounds = array<i64: 32, 32>}, {pipeline_mode = #tpu.pipeline_mode<synchronous>, transform_indices = @transform_10, window_bounds = array<i64: 1, 32>}, {transform_indices = @transform_11, window_bounds = array<i64: 1, 8, 32>}]} {
    %c0_i32 = arith.constant 0 : i32
    %0 = arith.cmpi eq, %arg1, %c0_i32 : i32
    %1 = arith.extui %0 : i1 to i32
    %c0_i32_0 = arith.constant 0 : i32
    %2 = arith.cmpi ne, %1, %c0_i32_0 : i32
    scf.if %2 {
      %c0_39 = arith.constant 0 : index
      %c0_40 = arith.constant 0 : index
      %c0_41 = arith.constant 0 : index
      %101 = vector.load %arg3[%c0_39, %c0_40, %c0_41] : memref<1x8x32xbf16, #tpu.memory_space<vmem>>, vector<1x8x32xbf16>
      %102 = vector.shape_cast %101 : vector<1x8x32xbf16> to vector<8x32xbf16>
      %c0_42 = arith.constant 0 : index
      %c0_43 = arith.constant 0 : index
      %c0_44 = arith.constant 0 : index
      %103 = vector.load %arg2[%c0_42, %c0_43, %c0_44] : memref<1x8x32xbf16, #tpu.memory_space<vmem>>, vector<1x8x32xbf16>
      %104 = vector.shape_cast %103 : vector<1x8x32xbf16> to vector<8x32xbf16>
      %c0_45 = arith.constant 0 : index
      %c0_46 = arith.constant 0 : index
      %105 = vector.load %arg7[%c0_45, %c0_46] : memref<32x32xbf16, #tpu.memory_space<vmem>>, vector<32x32xbf16>
      %cst_47 = arith.constant dense<0.000000e+00> : vector<8x32xf32>
      %106 = tpu.matmul %102, %105, %cst_47 {dimension_numbers = #tpu.dot_dimension_numbers<[1], [0], [0], [1], [0, 0, 1, 1], [], []>} : vector<8x32xbf16>, vector<32x32xbf16>, vector<8x32xf32> -> vector<8x32xf32>
      %c0_48 = arith.constant 0 : index
      %c0_49 = arith.constant 0 : index
      %107 = vector.load %arg8[%c0_48, %c0_49] : memref<1x32xf32, #tpu.memory_space<vmem>>, vector<1x32xf32>
      %108 = vector.broadcast %107 : vector<1x32xf32> to vector<8x32xf32>
      %109 = arith.addf %106, %108 : vector<8x32xf32>
      %c0_50 = arith.constant 0 : index
      %c0_51 = arith.constant 0 : index
      %110 = vector.load %arg5[%c0_50, %c0_51] : memref<32x32xbf16, #tpu.memory_space<vmem>>, vector<32x32xbf16>
      %cst_52 = arith.constant dense<0.000000e+00> : vector<8x32xf32>
      %111 = tpu.matmul %104, %110, %cst_52 {dimension_numbers = #tpu.dot_dimension_numbers<[1], [0], [0], [1], [0, 0, 1, 1], [], []>} : vector<8x32xbf16>, vector<32x32xbf16>, vector<8x32xf32> -> vector<8x32xf32>
      %c0_53 = arith.constant 0 : index
      %c0_54 = arith.constant 0 : index
      %112 = vector.load %arg6[%c0_53, %c0_54] : memref<1x32xf32, #tpu.memory_space<vmem>>, vector<1x32xf32>
      %113 = vector.broadcast %112 : vector<1x32xf32> to vector<8x32xf32>
      %114 = arith.addf %111, %113 : vector<8x32xf32>
      %115 = arith.truncf %109 : vector<8x32xf32> to vector<8x32xbf16>
      %c0_55 = arith.constant 0 : index
      %c0_56 = arith.constant 0 : index
      %116 = vector.load %arg14[%c0_55, %c0_56] : memref<8x32xbf16, #tpu.memory_space<vmem>>, vector<8x32xbf16>
      tpu.vector_store %arg14[%c0_55, %c0_56], %115 {strides = array<i32>} : memref<8x32xbf16, #tpu.memory_space<vmem>>, vector<8x32xbf16>,
      %117 = arith.truncf %114 : vector<8x32xf32> to vector<8x32xbf16>
      %c0_57 = arith.constant 0 : index
      %c0_58 = arith.constant 0 : index
      %118 = vector.load %arg15[%c0_57, %c0_58] : memref<8x32xbf16, #tpu.memory_space<vmem>>, vector<8x32xbf16>
      tpu.vector_store %arg15[%c0_57, %c0_58], %117 {strides = array<i32>} : memref<8x32xbf16, #tpu.memory_space<vmem>>, vector<8x32xbf16>,
    } else {
    }
    %c0 = arith.constant 0 : index
    %c0_1 = arith.constant 0 : index
    %c0_2 = arith.constant 0 : index
    %3 = vector.load %arg4[%c0, %c0_1, %c0_2] : memref<1x8x32xbf16, #tpu.memory_space<vmem>>, vector<1x8x32xbf16>
    %4 = vector.shape_cast %3 : vector<1x8x32xbf16> to vector<8x32xbf16>
    %c0_3 = arith.constant 0 : index
    %c0_4 = arith.constant 0 : index
    %5 = vector.load %arg9[%c0_3, %c0_4] : memref<32x32xbf16, #tpu.memory_space<vmem>>, vector<32x32xbf16>
    %cst = arith.constant dense<0.000000e+00> : vector<8x32xf32>
    %6 = tpu.matmul %4, %5, %cst {dimension_numbers = #tpu.dot_dimension_numbers<[1], [0], [0], [1], [0, 0, 1, 1], [], []>} : vector<8x32xbf16>, vector<32x32xbf16>, vector<8x32xf32> -> vector<8x32xf32>
    %c0_5 = arith.constant 0 : index
    %c0_6 = arith.constant 0 : index
    %7 = vector.load %arg10[%c0_5, %c0_6] : memref<1x32xf32, #tpu.memory_space<vmem>>, vector<1x32xf32>
    %8 = vector.broadcast %7 : vector<1x32xf32> to vector<8x32xf32>
    %9 = arith.addf %6, %8 : vector<8x32xf32>
    %10 = arith.truncf %9 : vector<8x32xf32> to vector<8x32xbf16>
    %c0_7 = arith.constant 0 : index
    %c0_8 = arith.constant 0 : index
    %11 = vector.load %arg14[%c0_7, %c0_8] : memref<8x32xbf16, #tpu.memory_space<vmem>>, vector<8x32xbf16>
    %c0_9 = arith.constant 0 : index
    %c0_10 = arith.constant 0 : index
    %12 = vector.load %arg15[%c0_9, %c0_10] : memref<8x32xbf16, #tpu.memory_space<vmem>>, vector<8x32xbf16>
    %c0_11 = arith.constant 0 : index
    %c0_12 = arith.constant 0 : index
    %13 = vector.load %arg11[%c0_11, %c0_12] : memref<32x32xbf16, #tpu.memory_space<vmem>>, vector<32x32xbf16>
    %cst_13 = arith.constant 0.000000e+00 : f32
    %14 = vector.broadcast %cst_13 : f32 to vector<8x32xf32>
    %15 = vector.extract_strided_slice %10 {offsets = [0, 0], sizes = [8, 8], strides = [1, 1]} : vector<8x32xbf16> to vector<8x8xbf16>
    %16 = vector.extract_strided_slice %11 {offsets = [0, 0], sizes = [8, 8], strides = [1, 1]} : vector<8x32xbf16> to vector<8x8xbf16>
    %17 = vector.extract_strided_slice %12 {offsets = [0, 0], sizes = [8, 8], strides = [1, 1]} : vector<8x32xbf16> to vector<8x8xbf16>
    %cst_14 = arith.constant dense<0.000000e+00> : vector<8x8xf32>
    %18 = tpu.matmul %15, %16, %cst_14 {dimension_numbers = #tpu.dot_dimension_numbers<[1], [1], [0], [0], [0, 0, 1, 0], [], []>} : vector<8x8xbf16>, vector<8x8xbf16>, vector<8x8xf32> -> vector<8x8xf32>
    %cst_15 = arith.constant dense<0xFF800000> : vector<8xf32>
    %19 = vector.multi_reduction <maximumf>, %18, %cst_15 [1] : vector<8x8xf32> to vector<8xf32>
    %20 = vector.shape_cast %19 : vector<8xf32> to vector<8x1xf32>
    %21 = vector.broadcast %20 : vector<8x1xf32> to vector<8x8xf32>
    %22 = arith.subf %18, %21 : vector<8x8xf32>
    %23 = math.exp %22 : vector<8x8xf32>
    %cst_16 = arith.constant dense<0.000000e+00> : vector<8xf32>
    %24 = vector.multi_reduction <add>, %23, %cst_16 [1] : vector<8x8xf32> to vector<8xf32>
    %25 = vector.shape_cast %24 : vector<8xf32> to vector<8x1xf32>
    %26 = tpu.reciprocal %25 : vector<8x1xf32> -> vector<8x1xf32>
    %27 = arith.truncf %23 : vector<8x8xf32> to vector<8x8xbf16>
    %cst_17 = arith.constant dense<0.000000e+00> : vector<8x8xf32>
    %28 = tpu.matmul %27, %17, %cst_17 {dimension_numbers = #tpu.dot_dimension_numbers<[1], [0], [0], [1], [0, 0, 1, 1], [], []>} : vector<8x8xbf16>, vector<8x8xbf16>, vector<8x8xf32> -> vector<8x8xf32>
    %29 = vector.broadcast %26 : vector<8x1xf32> to vector<8x8xf32>
    %30 = arith.mulf %28, %29 : vector<8x8xf32>
    %31 = arith.truncf %30 : vector<8x8xf32> to vector<8x8xbf16>
    %32 = vector.extract_strided_slice %13 {offsets = [0, 0], sizes = [8, 32], strides = [1, 1]} : vector<32x32xbf16> to vector<8x32xbf16>
    %cst_18 = arith.constant dense<0.000000e+00> : vector<8x32xf32>
    %33 = tpu.matmul %31, %32, %cst_18 {dimension_numbers = #tpu.dot_dimension_numbers<[1], [0], [0], [1], [0, 0, 1, 1], [], []>} : vector<8x8xbf16>, vector<8x32xbf16>, vector<8x32xf32> -> vector<8x32xf32>
    %34 = arith.addf %14, %33 : vector<8x32xf32>
    %35 = vector.extract_strided_slice %10 {offsets = [0, 8], sizes = [8, 8], strides = [1, 1]} : vector<8x32xbf16> to vector<8x8xbf16>
    %36 = vector.extract_strided_slice %11 {offsets = [0, 8], sizes = [8, 8], strides = [1, 1]} : vector<8x32xbf16> to vector<8x8xbf16>
    %37 = vector.extract_strided_slice %12 {offsets = [0, 8], sizes = [8, 8], strides = [1, 1]} : vector<8x32xbf16> to vector<8x8xbf16>
    %cst_19 = arith.constant dense<0.000000e+00> : vector<8x8xf32>
    %38 = tpu.matmul %35, %36, %cst_19 {dimension_numbers = #tpu.dot_dimension_numbers<[1], [1], [0], [0], [0, 0, 1, 0], [], []>} : vector<8x8xbf16>, vector<8x8xbf16>, vector<8x8xf32> -> vector<8x8xf32>
    %cst_20 = arith.constant dense<0xFF800000> : vector<8xf32>
    %39 = vector.multi_reduction <maximumf>, %38, %cst_20 [1] : vector<8x8xf32> to vector<8xf32>
    %40 = vector.shape_cast %39 : vector<8xf32> to vector<8x1xf32>
    %41 = vector.broadcast %40 : vector<8x1xf32> to vector<8x8xf32>
    %42 = arith.subf %38, %41 : vector<8x8xf32>
    %43 = math.exp %42 : vector<8x8xf32>
    %cst_21 = arith.constant dense<0.000000e+00> : vector<8xf32>
    %44 = vector.multi_reduction <add>, %43, %cst_21 [1] : vector<8x8xf32> to vector<8xf32>
    %45 = vector.shape_cast %44 : vector<8xf32> to vector<8x1xf32>
    %46 = tpu.reciprocal %45 : vector<8x1xf32> -> vector<8x1xf32>
    %47 = arith.truncf %43 : vector<8x8xf32> to vector<8x8xbf16>
    %cst_22 = arith.constant dense<0.000000e+00> : vector<8x8xf32>
    %48 = tpu.matmul %47, %37, %cst_22 {dimension_numbers = #tpu.dot_dimension_numbers<[1], [0], [0], [1], [0, 0, 1, 1], [], []>} : vector<8x8xbf16>, vector<8x8xbf16>, vector<8x8xf32> -> vector<8x8xf32>
    %49 = vector.broadcast %46 : vector<8x1xf32> to vector<8x8xf32>
    %50 = arith.mulf %48, %49 : vector<8x8xf32>
    %51 = arith.truncf %50 : vector<8x8xf32> to vector<8x8xbf16>
    %52 = vector.extract_strided_slice %13 {offsets = [8, 0], sizes = [8, 32], strides = [1, 1]} : vector<32x32xbf16> to vector<8x32xbf16>
    %cst_23 = arith.constant dense<0.000000e+00> : vector<8x32xf32>
    %53 = tpu.matmul %51, %52, %cst_23 {dimension_numbers = #tpu.dot_dimension_numbers<[1], [0], [0], [1], [0, 0, 1, 1], [], []>} : vector<8x8xbf16>, vector<8x32xbf16>, vector<8x32xf32> -> vector<8x32xf32>
    %54 = arith.addf %34, %53 : vector<8x32xf32>
    %55 = vector.extract_strided_slice %10 {offsets = [0, 16], sizes = [8, 8], strides = [1, 1]} : vector<8x32xbf16> to vector<8x8xbf16>
    %56 = vector.extract_strided_slice %11 {offsets = [0, 16], sizes = [8, 8], strides = [1, 1]} : vector<8x32xbf16> to vector<8x8xbf16>
    %57 = vector.extract_strided_slice %12 {offsets = [0, 16], sizes = [8, 8], strides = [1, 1]} : vector<8x32xbf16> to vector<8x8xbf16>
    %cst_24 = arith.constant dense<0.000000e+00> : vector<8x8xf32>
    %58 = tpu.matmul %55, %56, %cst_24 {dimension_numbers = #tpu.dot_dimension_numbers<[1], [1], [0], [0], [0, 0, 1, 0], [], []>} : vector<8x8xbf16>, vector<8x8xbf16>, vector<8x8xf32> -> vector<8x8xf32>
    %cst_25 = arith.constant dense<0xFF800000> : vector<8xf32>
    %59 = vector.multi_reduction <maximumf>, %58, %cst_25 [1] : vector<8x8xf32> to vector<8xf32>
    %60 = vector.shape_cast %59 : vector<8xf32> to vector<8x1xf32>
    %61 = vector.broadcast %60 : vector<8x1xf32> to vector<8x8xf32>
    %62 = arith.subf %58, %61 : vector<8x8xf32>
    %63 = math.exp %62 : vector<8x8xf32>
    %cst_26 = arith.constant dense<0.000000e+00> : vector<8xf32>
    %64 = vector.multi_reduction <add>, %63, %cst_26 [1] : vector<8x8xf32> to vector<8xf32>
    %65 = vector.shape_cast %64 : vector<8xf32> to vector<8x1xf32>
    %66 = tpu.reciprocal %65 : vector<8x1xf32> -> vector<8x1xf32>
    %67 = arith.truncf %63 : vector<8x8xf32> to vector<8x8xbf16>
    %cst_27 = arith.constant dense<0.000000e+00> : vector<8x8xf32>
    %68 = tpu.matmul %67, %57, %cst_27 {dimension_numbers = #tpu.dot_dimension_numbers<[1], [0], [0], [1], [0, 0, 1, 1], [], []>} : vector<8x8xbf16>, vector<8x8xbf16>, vector<8x8xf32> -> vector<8x8xf32>
    %69 = vector.broadcast %66 : vector<8x1xf32> to vector<8x8xf32>
    %70 = arith.mulf %68, %69 : vector<8x8xf32>
    %71 = arith.truncf %70 : vector<8x8xf32> to vector<8x8xbf16>
    %72 = vector.extract_strided_slice %13 {offsets = [16, 0], sizes = [8, 32], strides = [1, 1]} : vector<32x32xbf16> to vector<8x32xbf16>
    %cst_28 = arith.constant dense<0.000000e+00> : vector<8x32xf32>
    %73 = tpu.matmul %71, %72, %cst_28 {dimension_numbers = #tpu.dot_dimension_numbers<[1], [0], [0], [1], [0, 0, 1, 1], [], []>} : vector<8x8xbf16>, vector<8x32xbf16>, vector<8x32xf32> -> vector<8x32xf32>
    %74 = arith.addf %54, %73 : vector<8x32xf32>
    %75 = vector.extract_strided_slice %10 {offsets = [0, 24], sizes = [8, 8], strides = [1, 1]} : vector<8x32xbf16> to vector<8x8xbf16>
    %76 = vector.extract_strided_slice %11 {offsets = [0, 24], sizes = [8, 8], strides = [1, 1]} : vector<8x32xbf16> to vector<8x8xbf16>
    %77 = vector.extract_strided_slice %12 {offsets = [0, 24], sizes = [8, 8], strides = [1, 1]} : vector<8x32xbf16> to vector<8x8xbf16>
    %cst_29 = arith.constant dense<0.000000e+00> : vector<8x8xf32>
    %78 = tpu.matmul %75, %76, %cst_29 {dimension_numbers = #tpu.dot_dimension_numbers<[1], [1], [0], [0], [0, 0, 1, 0], [], []>} : vector<8x8xbf16>, vector<8x8xbf16>, vector<8x8xf32> -> vector<8x8xf32>
    %cst_30 = arith.constant dense<0xFF800000> : vector<8xf32>
    %79 = vector.multi_reduction <maximumf>, %78, %cst_30 [1] : vector<8x8xf32> to vector<8xf32>
    %80 = vector.shape_cast %79 : vector<8xf32> to vector<8x1xf32>
    %81 = vector.broadcast %80 : vector<8x1xf32> to vector<8x8xf32>
    %82 = arith.subf %78, %81 : vector<8x8xf32>
    %83 = math.exp %82 : vector<8x8xf32>
    %cst_31 = arith.constant dense<0.000000e+00> : vector<8xf32>
    %84 = vector.multi_reduction <add>, %83, %cst_31 [1] : vector<8x8xf32> to vector<8xf32>
    %85 = vector.shape_cast %84 : vector<8xf32> to vector<8x1xf32>
    %86 = tpu.reciprocal %85 : vector<8x1xf32> -> vector<8x1xf32>
    %87 = arith.truncf %83 : vector<8x8xf32> to vector<8x8xbf16>
    %cst_32 = arith.constant dense<0.000000e+00> : vector<8x8xf32>
    %88 = tpu.matmul %87, %77, %cst_32 {dimension_numbers = #tpu.dot_dimension_numbers<[1], [0], [0], [1], [0, 0, 1, 1], [], []>} : vector<8x8xbf16>, vector<8x8xbf16>, vector<8x8xf32> -> vector<8x8xf32>
    %89 = vector.broadcast %86 : vector<8x1xf32> to vector<8x8xf32>
    %90 = arith.mulf %88, %89 : vector<8x8xf32>
    %91 = arith.truncf %90 : vector<8x8xf32> to vector<8x8xbf16>
    %92 = vector.extract_strided_slice %13 {offsets = [24, 0], sizes = [8, 32], strides = [1, 1]} : vector<32x32xbf16> to vector<8x32xbf16>
    %cst_33 = arith.constant dense<0.000000e+00> : vector<8x32xf32>
    %93 = tpu.matmul %91, %92, %cst_33 {dimension_numbers = #tpu.dot_dimension_numbers<[1], [0], [0], [1], [0, 0, 1, 1], [], []>} : vector<8x8xbf16>, vector<8x32xbf16>, vector<8x32xf32> -> vector<8x32xf32>
    %94 = arith.addf %74, %93 : vector<8x32xf32>
    %c0_34 = arith.constant 0 : index
    %c0_35 = arith.constant 0 : index
    %95 = vector.load %arg12[%c0_34, %c0_35] : memref<1x32xf32, #tpu.memory_space<vmem>>, vector<1x32xf32>
    %96 = vector.broadcast %95 : vector<1x32xf32> to vector<8x32xf32>
    %97 = arith.addf %94, %96 : vector<8x32xf32>
    %c0_36 = arith.constant 0 : index
    %c0_37 = arith.constant 0 : index
    %c0_38 = arith.constant 0 : index
    %98 = vector.load %arg13[%c0_36, %c0_37, %c0_38] : memref<1x8x32xf32, #tpu.memory_space<vmem>>, vector<1x8x32xf32>
    %99 = vector.shape_cast %98 : vector<1x8x32xf32> to vector<8x32xf32>
    %100 = vector.shape_cast %97 : vector<8x32xf32> to vector<1x8x32xf32>
    tpu.vector_store %arg13[%c0_36, %c0_37, %c0_38], %100 {strides = array<i32>} : memref<1x8x32xf32, #tpu.memory_space<vmem>>, vector<1x8x32xf32>,
    return
  }
  func.func @transform_0(%arg0: i32, %arg1: i32) -> (i32, i32, i32) {
    %c0_i32 = arith.constant 0 : i32
    %c0_i32_0 = arith.constant 0 : i32
    %c0_i32_1 = arith.constant 0 : i32
    return %arg0, %c0_i32, %c0_i32_0 : i32, i32, i32
  }
  func.func @transform_1(%arg0: i32, %arg1: i32) -> (i32, i32, i32) {
    %c0_i32 = arith.constant 0 : i32
    %c0_i32_0 = arith.constant 0 : i32
    %c0_i32_1 = arith.constant 0 : i32
    return %arg0, %c0_i32, %c0_i32_0 : i32, i32, i32
  }
  func.func @transform_2(%arg0: i32, %arg1: i32) -> (i32, i32, i32) {
    %c0_i32 = arith.constant 0 : i32
    %c0_i32_0 = arith.constant 0 : i32
    return %arg0, %arg1, %c0_i32 : i32, i32, i32
  }
  func.func @transform_3(%arg0: i32, %arg1: i32) -> (i32, i32) {
    %c0_i32 = arith.constant 0 : i32
    %c0_i32_0 = arith.constant 0 : i32
    %c0_i32_1 = arith.constant 0 : i32
    return %c0_i32, %c0_i32_0 : i32, i32
  }
  func.func @transform_4(%arg0: i32, %arg1: i32) -> (i32, i32) {
    %c0_i32 = arith.constant 0 : i32
    %c0_i32_0 = arith.constant 0 : i32
    %c0_i32_1 = arith.constant 0 : i32
    return %c0_i32, %c0_i32_0 : i32, i32
  }
  func.func @transform_5(%arg0: i32, %arg1: i32) -> (i32, i32) {
    %c0_i32 = arith.constant 0 : i32
    %c0_i32_0 = arith.constant 0 : i32
    %c0_i32_1 = arith.constant 0 : i32
    return %c0_i32, %c0_i32_0 : i32, i32
  }
  func.func @transform_6(%arg0: i32, %arg1: i32) -> (i32, i32) {
    %c0_i32 = arith.constant 0 : i32
    %c0_i32_0 = arith.constant 0 : i32
    %c0_i32_1 = arith.constant 0 : i32
    return %c0_i32, %c0_i32_0 : i32, i32
  }
  func.func @transform_7(%arg0: i32, %arg1: i32) -> (i32, i32) {
    %c0_i32 = arith.constant 0 : i32
    %c0_i32_0 = arith.constant 0 : i32
    %c0_i32_1 = arith.constant 0 : i32
    return %c0_i32, %c0_i32_0 : i32, i32
  }
  func.func @transform_8(%arg0: i32, %arg1: i32) -> (i32, i32) {
    %c0_i32 = arith.constant 0 : i32
    %c0_i32_0 = arith.constant 0 : i32
    %c0_i32_1 = arith.constant 0 : i32
    return %c0_i32, %c0_i32_0 : i32, i32
  }
  func.func @transform_9(%arg0: i32, %arg1: i32) -> (i32, i32) {
    %c0_i32 = arith.constant 0 : i32
    %c0_i32_0 = arith.constant 0 : i32
    %c0_i32_1 = arith.constant 0 : i32
    return %c0_i32, %c0_i32_0 : i32, i32
  }
  func.func @transform_10(%arg0: i32, %arg1: i32) -> (i32, i32) {
    %c0_i32 = arith.constant 0 : i32
    %c0_i32_0 = arith.constant 0 : i32
    %c0_i32_1 = arith.constant 0 : i32
    return %c0_i32, %c0_i32_0 : i32, i32
  }
  func.func @transform_11(%arg0: i32, %arg1: i32) -> (i32, i32, i32) {
    %c0_i32 = arith.constant 0 : i32
    %c0_i32_0 = arith.constant 0 : i32
    return %arg0, %arg1, %c0_i32 : i32, i32, i32
  }
}

</mosaic_0001>

<bundles_post_ra>
// kernel: tpu_custom_call.1
= control target key start
LH: loop header
LB: loop body
LE: loop exit
PB: predicated region body
PF: predicated region fallthrough
CT: control target
= control target key end

     0   :  { %s2801_s0 = inlined_call_operand.hbm [shape: bf16[2,8,32], index: 0, kind: input, shape index: {}]   ;;  %s2802_s1 = inlined_call_operand.hbm [shape: bf16[2,8,32], index: 1, kind: input, shape index: {}]   ;;  %s2803_s2 = inlined_call_operand.hbm [shape: bf16[2,8,32], index: 2, kind: input, shape index: {}]   ;;  %s2804_s3 = inlined_call_operand.hbm [shape: bf16[32,32], index: 3, kind: input, shape index: {}]   ;;  %s2805_s4 = inlined_call_operand.hbm [shape: f32[1,32], index: 4, kind: input, shape index: {}]   ;;  %s2806_s5 = inlined_call_operand.hbm [shape: bf16[32,32], index: 5, kind: input, shape index: {}]   ;;  %s2807_s6 = inlined_call_operand.hbm [shape: f32[1,32], index: 6, kind: input, shape index: {}]   ;;  %s2808_s7 = inlined_call_operand.hbm [shape: bf16[32,32], index: 7, kind: input, shape index: {}]   ;;  %s2809_s8 = inlined_call_operand.hbm [shape: f32[1,32], index: 8, kind: input, shape index: {}]   ;;  %s2810_s9 = inlined_call_operand.vmem [shape: bf16[32,32], index: 9, kind: input, shape index: {}]   ;;  %s2811_s10 = inlined_call_operand.vmem [shape: f32[1,32], index: 10, kind: input, shape index: {}]   ;;  %s2812_s11 = inlined_call_operand.hbm [shape: f32[2,8,32], index: 11, kind: output, shape index: {}]  }
   0x1   :  { %2830 = sst [smem:[#allocation33_spill]] %s2804_s3 }
   0x2   :  { %2831 = sst [smem:[#allocation34_spill]] %s2806_s5 }
   0x3   :  { %2832 = sst [smem:[#allocation35_spill]] %s2808_s7 }
   0x4   :  { %2833 = sst [smem:[#allocation36_spill]] %s2812_s11 }
   0x5   :  { %16 = vsyncpa [#allocation5], 0 }
   0x6   :  { %18 = vsyncpa [#allocation5 + $0x1], 0 }
   0x7   :  { %19 = vsyncpa [#allocation8], 0 }
   0x8   :  { %21 = vsyncpa [#allocation8 + $0x1], 0 }
   0x9   :  { %22 = vsyncpa [#allocation11], 0 }
   0xa   :  { %23 = vsyncpa [#allocation14], 0 }
   0xb   :  { %24 = vsyncpa [#allocation17], 0 }
   0xc   :  { %25 = vsyncpa [#allocation6], 0 }
   0xd   :  { %27 = vsyncpa [#allocation6 + $0x1], 0  ;;  %s2394_s17 = smov 0   ;;  %s2396_s18 = smov 0  }
   0xe   :  { %s2398_s19 = smov 0   ;;  %s2400_s20 = smov 0  }
   0xf   :  { %s2402_s21 = smov 0   ;;  %s2404_s22 = smov 0  }
  0x10 LB: > { %2834 = sst [smem:[#allocation26_spill]] %s2295_s17  ;;  %s2425_s23 = sadd.s32 4294967295, %s2315_s22   ;;  %s2315_s22 = sphi %s2404_s22, %s33_s22   ;;  %s2311_s21 = sphi %s2402_s21, %s2875_s21   ;;  %s2307_s20 = sphi %s2400_s20, %s2874_s20   ;;  %s2303_s19 = sphi %s2398_s19, %s2878_s19   ;;  %s2299_s18 = sphi %s2396_s18, %s2877_s18   ;;  %s2295_s17 = sphi %s2394_s17, %s2876_s17  }
  0x11   : > { %2835 = sst [smem:[#allocation27_spill]] %s2311_s21  ;;  %p1630_p0 = scmp.ge.s32.totalorder %s2315_s22, 1 }
  0x12   : > { %2836 = sst [smem:[#allocation28_spill]] %s2315_s22  ;;  %p2813_p1 = scmp.eq.s32.totalorder %s2425_s23, 0 }
  0x13   : > { %p326_p2 = scmp.lt.s32.totalorder %s2315_s22, 3  ;;  %s2317_s25 = smov [#allocation10]  }
  0x14   : > { %s338_s26 = sshll.u32 %s2317_s25, 4  ;;  %s2318_s28 = smov [#allocation13]   ;;  %s339_s26 = int_to_ptr.vmem [resolvable:$true] %s338_s26 }
  0x15   : > { %p2430_p3 = pnand %p1630_p0, %p326_p2  ;;  %s362_s29 = sshll.u32 %s2318_s28, 4  ;;  %s363_s29 = int_to_ptr.vmem [resolvable:$true] %s362_s29 }
  0x16   : > { %s2319_s30 = smov [#allocation16]   ;;  %s1990_s14 = scalar_lea.vmem %s339_s26, 256 }
  0x17   : > { %s2837_s24 = scalar_select %p2430_p3, 1, 0 }
  0x18   : > { %p1847_p4 = pneg %p2430_p3  ;;  %s386_s12 = sshll.u32 %s2319_s30, 4  ;;  %s387_s12 = int_to_ptr.vmem [resolvable:$true] %s386_s12 }
  0x19   : > { %p1991_p8 = scmp.ne.s32.totalorder %s339_s26, %s1990_s14  ;;  %p1998_p11 = scmp.lt.s32.totalorder %s339_s26, %s339_s26 }
  0x1a   : > { %p2439_p6 = pnand %p1847_p4, %p2813_p1  ;;  %p1999_p12 = scmp.lt.s32.totalorder %s1990_s14, %s1990_s14 }
  0x1c   : > { %s2838_s27 = scalar_select %p2439_p6, 1, 0 }
  0x1d   : > { %p2445_p7 = pneg %p2439_p6  ;;  %p2000_p13 = por %p1999_p12, %p1998_p11 }
  0x1f   : > { %p1993_p9 = pnand %p1991_p8, %p2445_p7 }
  0x21   : > { %p1994_p10 = pneg %p1993_p9 }
  0x23   : > { %p2001_p0 = pnand %p2000_p13, %p1994_p10 }
  0x25   : > { %2004 = shalt.err (!%p2001_p0)
}
  0x26   : > { %s2320_s15 = smov 64   ;;  %s2321_s16 = smov 4  }
  0x27   : > { %s2840_s3 = sld [smem:[#allocation33_spill]]  ;;  %s2016_s30 = scalar_lea.vmem %s363_s29, 256 }
  0x28   : > { %p2017_p2 = scmp.ne.s32.totalorder %s363_s29, %s2016_s30  ;;  %p2024_p9 = scmp.lt.s32.totalorder %s363_s29, %s363_s29 }
  0x29   : > { %p2025_p5 = scmp.lt.s32.totalorder %s2016_s30, %s2016_s30 }
  0x2a   : > { %p2019_p4 = pnand %p2017_p2, %p2445_p7 }
  0x2b   : > { %p2026_p1 = por %p2025_p5, %p2024_p9 }
  0x2c   : > { %p2020_p8 = pneg %p2019_p4 }
  0x2d   : > { %1850 = dma.hbm_to_vmem [thread:$0]  (!%p2439_p6), %s2840_s3, 256, %s339_s26, [#allocation11], %s2320_s15, %s2320_s15, %s2321_s16  }
  0x2e   : > { %p2027_p11 = pnand %p2026_p1, %p2020_p8 }
  0x30   : > { %2030 = shalt.err (!%p2027_p11)
}
  0x31   : > { %s2841_s5 = sld [smem:[#allocation34_spill]]  ;;  %s2042_s25 = scalar_lea.vmem %s387_s12, 256 }
  0x32   : > { %p2043_p10 = scmp.ne.s32.totalorder %s387_s12, %s2042_s25  ;;  %p2050_p0 = scmp.lt.s32.totalorder %s387_s12, %s387_s12 }
  0x33   : > { %p2051_p2 = scmp.lt.s32.totalorder %s2042_s25, %s2042_s25 }
  0x34   : > { %p2045_p12 = pnand %p2043_p10, %p2445_p7 }
  0x35   : > { %p2052_p4 = por %p2051_p2, %p2050_p0 }
  0x36   : > { %p2046_p13 = pneg %p2045_p12 }
  0x37   : > { %1856 = dma.hbm_to_vmem [thread:$0]  (!%p2439_p6), %s2841_s5, 256, %s363_s29, [#allocation14], %s2320_s15, %s2320_s15, %s2321_s16  }
  0x38   : > { %p2053_p3 = pnand %p2052_p4, %p2046_p13 }
  0x3a   : > { %2056 = shalt.err (!%p2053_p3)
}
  0x3b   : > { %s2842_s7 = sld [smem:[#allocation35_spill]]  ;;  %s1629_s11 = sadd.s32 4294967294, %s2315_s22  }
  0x3c   : > { %s45_s29 = sadd.s32 1, %s2311_s21  ;;  %s52_s30 = sadd.s32 1, %s2303_s19 }
  0x3d   : > { %p47_p1 = scmp.ge.s32.totalorder %s45_s29, 2  ;;  %p59_p3 = scmp.ne.s32.totalorder %s2303_s19, %s2299_s18 }
  0x3e   : > { %p60_p5 = scmp.eq.s32.totalorder %s2315_s22, 0  ;;  %p65_p8 = scmp.ne.s32.totalorder %s2299_s18, %s2295_s17 }
  0x3f   : > { %s2880_s29 = smov (%p47_p1, %s45_s29), 0  ;;  %p2845_p11 = scmp.eq.s32.totalorder %s2425_s23, 0 }
  0x40   : > { %2843 = sst [smem:[#allocation29_spill]] %s2880_s29  ;;  %p2480_p9 = por %p60_p5, %p59_p3 }
  0x41   : > { %1862 = dma.hbm_to_vmem [thread:$0]  (!%p2439_p6), %s2842_s7, 256, %s387_s12, [#allocation17], %s2320_s15, %s2320_s15, %s2321_s16  }
  0x42   : > { %p2486_p10 = por %p2845_p11, %p65_p8  ;;  %s49_s15 = ssub.s32 %s2311_s21, %s2880_s29 }
  0x43   : > { %p313_p12 = scmp.eq.s32.totalorder %s2425_s23, 1  ;;  %p50_p13 = scmp.eq.s32.totalorder %s49_s15, 0 }
  0x44   : > { %s2846_s12 = scalar_select %p2486_p10, 1, 0 }
  0x45   : > { %p319_p0 = scmp.eq.s32.totalorder %s1629_s11, 1  ;;  %p2493_p2 = por %p313_p12, %p59_p3 }
  0x46   : > { %p1886_p4 = scmp.lt.s32.totalorder %s2315_s22, 2  ;;  %s2818_s28 = sand.u32 1, %s2303_s19  }
  0x47   : > { %s2847_s16 = scalar_select %p2493_p2, 1, 0 }
  0x48   : > { %s2499_s25 = scalar_select %p50_p13, %s2303_s19, %s52_s30  }
  0x49   : > { %2848 = sst [smem:[#allocation30_spill]] %s2847_s16  ;;  %p2501_p1 = por %p319_p0, %p65_p8 }
  0x4a   : > { %2849 = sst [smem:[#allocation31_spill]] %s2499_s25  ;;  %s2508_s3 = sshll.u32 %s2818_s28, 2 }
  0x4b   : > { %s2850_s26 = scalar_select %p2501_p1, 1, 0 }
  0x4c   : > { %s2511_s5 = sshll.u32 %s2311_s21, 6  ;;  %p2515_p3 = pnand %p1886_p4, %p2480_p9 }
  0x4d   : > { %2851 = sst [smem:[#allocation32_spill]] %s2850_s26  ;;  %s435_s30 = sand.u32 1, %s2315_s22  }
  0x4e   : > { %s444_s29 = scalar_lea.hbm %s2802_s1, %s2511_s5  ;;  %s439_s25 = scalar_lea.vmem [#allocation7], %s2508_s3 }
  0x4f   : > { %s446_s26 = sshll.u32 %s439_s25, 4  ;;  %s2322_s28 = smov [#allocation12]   ;;  %s447_s26 = int_to_ptr.vmem [resolvable:$true] %s446_s26 }
  0x50   : > { %s352_s17 = sshll.u32 %s2322_s28, 4  ;;  %s2525_s21 = scalar_lea.sflag [#allocation8], %s435_s30  ;;  %s353_s17 = int_to_ptr.vmem [resolvable:$true] %s352_s17 }
  0x51   : > { %p2825_p5 = pneg %p2515_p3  ;;  %s2070_s14 = scalar_lea.vmem %s447_s26, 64 }
  0x52   : > { %p2071_p8 = scmp.ne.s32.totalorder %s447_s26, %s2070_s14  ;;  %s2323_s22 = smov [#allocation7]  }
  0x53   : > { %s2075_s16 = sshll.u32 %s2323_s22, 4  ;;  %s2076_s16 = int_to_ptr.vmem [resolvable:$false] %s2075_s16 }
  0x54   : > { %p2073_p9 = pnand %p2071_p8, %p2825_p5  ;;  %s2077_s7 = scalar_lea.vmem %s2076_s16, 128 }
  0x55   : > { %p2078_p12 = scmp.lt.s32.totalorder %s447_s26, %s2076_s16  ;;  %p2079_p13 = scmp.lt.s32.totalorder %s2077_s7, %s2070_s14 }
  0x56   : > { %p2074_p11 = pneg %p2073_p9 }
  0x57   : > { %p2080_p0 = por %p2079_p13, %p2078_p12 }
  0x59   : > { %p2081_p4 = pnand %p2080_p0, %p2074_p11 }
  0x5b   : > { %2084 = shalt.err (!%p2081_p4)
}
  0x5c   : > { %1872 = dma.hbm_to_vmem [thread:$0]  (!%p2515_p3), %s444_s29, 64, %s447_s26, %s2525_s21  }
  0x5d   : > { %s2096_s25 = scalar_lea.vmem %s353_s17, 16  ;;  %s2103_s28 = scalar_lea.vmem %s353_s17, 32 }
  0x5e   : > { %p2097_p1 = scmp.ne.s32.totalorder %s353_s17, %s2096_s25  ;;  %p2104_p5 = scmp.lt.s32.totalorder %s353_s17, %s353_s17 }
  0x5f   : > { %p2105_p2 = scmp.lt.s32.totalorder %s2103_s28, %s2096_s25 }
  0x60   : > { %p2099_p8 = pnand %p2097_p1, %p2445_p7 }
  0x61   : > { %p2106_p10 = por %p2105_p2, %p2104_p5 }
  0x62   : > { %p2100_p9 = pneg %p2099_p8 }
  0x64   : > { %p2107_p6 = pnand %p2106_p10, %p2100_p9 }
  0x66   : > { %2110 = shalt.err (!%p2107_p6)
}
  0x67   : > { %p2853_p11 = scmp.ne.s32.totalorder %s2838_s27, 0  ;;  %s2324_s29 = smov [#allocation15]  }
  0x68   : > { %s376_s26 = sshll.u32 %s2324_s29, 4  ;;  %s2325_s30 = smov [#allocation18]   ;;  %s377_s26 = int_to_ptr.vmem [resolvable:$true] %s376_s26 }
  0x69   : > { %1853 = dma.hbm_to_vmem [thread:$0]  (!%p2853_p11), %s2805_s4, 16, %s353_s17, [#allocation11]  }
  0x6a   : > { %s400_s15 = sshll.u32 %s2325_s30, 4  ;;  %s2122_s14 = scalar_lea.vmem %s377_s26, 16  ;;  %s401_s15 = int_to_ptr.vmem [resolvable:$true] %s400_s15 }
  0x6b   : > { %p2123_p1 = scmp.ne.s32.totalorder %s377_s26, %s2122_s14  ;;  %s2129_s7 = scalar_lea.vmem %s377_s26, 32 }
  0x6c   : > { %p2130_p10 = scmp.lt.s32.totalorder %s377_s26, %s377_s26  ;;  %p2131_p6 = scmp.lt.s32.totalorder %s2129_s7, %s2122_s14 }
  0x6d   : > { %p2125_p12 = pnand %p2123_p1, %p2445_p7 }
  0x6e   : > { %p2132_p2 = por %p2131_p6, %p2130_p10 }
  0x6f   : > { %p2126_p13 = pneg %p2125_p12 }
  0x71   : > { %p2133_p5 = pnand %p2132_p2, %p2126_p13 }
  0x73   : > { %2136 = shalt.err (!%p2133_p5)
}
  0x74   : > { %1859 = dma.hbm_to_vmem [thread:$0]  (!%p2853_p11), %s2807_s6, 16, %s377_s26, [#allocation14]  }
  0x75   : > { %s2148_s28 = scalar_lea.vmem %s401_s15, 16  ;;  %s2155_s22 = scalar_lea.vmem %s401_s15, 32 }
  0x76   : > { %p2149_p0 = scmp.ne.s32.totalorder %s401_s15, %s2148_s28  ;;  %p2156_p9 = scmp.lt.s32.totalorder %s401_s15, %s401_s15 }
  0x77   : > { %p2157_p1 = scmp.lt.s32.totalorder %s2155_s22, %s2148_s28 }
  0x78   : > { %p2151_p4 = pnand %p2149_p0, %p2445_p7 }
  0x79   : > { %p2158_p12 = por %p2157_p1, %p2156_p9 }
  0x7a   : > { %p2152_p8 = pneg %p2151_p4 }
  0x7c   : > { %p2159_p10 = pnand %p2158_p12, %p2152_p8 }
  0x7e   : > { %2162 = shalt.err (!%p2159_p10)
}
  0x7f   : > { %1865 = dma.hbm_to_vmem [thread:$0]  (!%p2853_p11), %s2809_s8, 16, %s401_s15, [#allocation17]  }
  0x80   : > { %s426_s30 = scalar_lea.hbm %s2801_s0, %s2511_s5  ;;  %s421_s14 = scalar_lea.vmem [#allocation4], %s2508_s3 }
  0x81   : > { %s428_s7 = sshll.u32 %s421_s14, 4  ;;  %s463_s27 = scalar_lea.hbm %s2803_s2, %s2511_s5  ;;  %s429_s7 = int_to_ptr.vmem [resolvable:$true] %s428_s7 }
  0x82   : > { %s2854_s28 = sand.u32 1, %s2303_s19   ;;  %s2176_s16 = scalar_lea.vmem %s429_s7, 64 }
  0x83   : > { %s418_s22 = scalar_lea.sflag [#allocation5], %s2854_s28  ;;  %p2177_p7 = scmp.ne.s32.totalorder %s429_s7, %s2176_s16 }
  0x84   : > { %p2855_p13 = pneg %p2515_p3  ;;  %s2326_s15 = smov [#allocation4]  }
  0x85   : > { %s2181_s29 = sshll.u32 %s2326_s15, 4  ;;  %s2182_s29 = int_to_ptr.vmem [resolvable:$false] %s2181_s29 }
  0x86   : > { %p2179_p6 = pnand %p2177_p7, %p2855_p13  ;;  %s2183_s13 = scalar_lea.vmem %s2182_s29, 128 }
  0x87   : > { %p2184_p11 = scmp.lt.s32.totalorder %s429_s7, %s2182_s29  ;;  %p2185_p5 = scmp.lt.s32.totalorder %s2183_s13, %s2176_s16 }
  0x88   : > { %p2180_p2 = pneg %p2179_p6 }
  0x89   : > { %p2186_p0 = por %p2185_p5, %p2184_p11 }
  0x8b   : > { %p2187_p4 = pnand %p2186_p0, %p2180_p2 }
  0x8d   : > { %2190 = shalt.err (!%p2187_p4)
}
  0x8e   : > { %1869 = dma.hbm_to_vmem [thread:$0]  (!%p2515_p3), %s426_s30, 64, %s429_s7, %s418_s22  }
  0x8f   : > { %s457_s26 = scalar_lea.vmem [#allocation9], %s2508_s3  ;;  %p2856_p9 = pmov %p2855_p13 }
  0x90   : > { %s465_s14 = sshll.u32 %s457_s26, 4  ;;  %s2327_s17 = smov [#allocation9]   ;;  %s466_s14 = int_to_ptr.vmem [resolvable:$true] %s465_s14 }
  0x91   : > { %s2204_s25 = scalar_lea.vmem %s466_s14, 64  ;;  %s2209_s28 = sshll.u32 %s2327_s17, 4  ;;  %s2210_s28 = int_to_ptr.vmem [resolvable:$false] %s2209_s28 }
  0x92   : > { %p2205_p8 = scmp.ne.s32.totalorder %s466_s14, %s2204_s25  ;;  %s2211_s16 = scalar_lea.vmem %s2210_s28, 128 }
  0x93   : > { %p2212_p10 = scmp.lt.s32.totalorder %s466_s14, %s2210_s28  ;;  %p2213_p7 = scmp.lt.s32.totalorder %s2211_s16, %s2204_s25 }
  0x94   : > { %p2207_p1 = pnand %p2205_p8, %p2856_p9 }
  0x95   : > { %p2214_p13 = por %p2213_p7, %p2212_p10 }
  0x96   : > { %p2208_p12 = pneg %p2207_p1 }
  0x98   : > { %p2215_p6 = pnand %p2214_p13, %p2208_p12 }
  0x9a   : > { %2218 = shalt.err (!%p2215_p6)
}
  0x9b   : > { %1875 = dma.hbm_to_vmem [thread:$0]  (!%p2515_p3), %s463_s27, 64, %s466_s14, %s2525_s21  }
  0x9c   : > { %p2857_p2 = scmp.ne.s32.totalorder %s2837_s24, 0 }
  0x9d   : > { %s2587_s7 = sand.u32 (!%p2857_p2), 1, %s2299_s18   ;;  %p2858_p11 = scmp.ne.s32.totalorder (!%p2857_p2), %s2846_s12, 0 }
  0x9e   : > { %474 = sbr.rel (%p2857_p2) target bundleno = 2193 (0x891), region = 64  ;;  %s2590_s22 = sshll.u32 (!%p2857_p2), %s2587_s7, 2 }
  0x9f   : > { %s477_s11 = scalar_lea.sflag (!%p2857_p2), [#allocation5], %s2587_s7  ;;  %s480_s15 = scalar_lea.vmem (!%p2857_p2), [#allocation4], %s2590_s22 }
  0xa3   : > { %2270 = dma.done.wait (%p2858_p11), %s477_s11, 64  }
  0xa4   : > { %2272 = vsyncadd (%p2858_p11), %s477_s11, 4294967232  ;;  %s485_s5 = sand.u32 1, %s2425_s23   ;;  %s489_s24 = scalar_lea.vmem [#allocation7], %s2590_s22 }
  0xa5   : > { %s486_s21 = scalar_lea.sflag [#allocation8], %s485_s5 }
  0xa6   : > { %2274 = dma.done.wait (%p2858_p11), %s486_s21, 128  }
  0xa7   : > { %2276 = vsyncadd (%p2858_p11), %s486_s21, 4294967168  ;;  %s498_s27 = scalar_lea.vmem [#allocation9], %s2590_s22  ;;  %p2859_p3 = scmp.eq.s32.totalorder %s2425_s23, 0 }
  0xa9   : > { %2278 = dma.done.wait (%p2859_p3), [#allocation11], 272   ;;  %p2860_p5 = pmov %p2859_p3 }
  0xaa   : > { %p2861_p0 = pmov %p2859_p3 }
  0xab   : > { %2280 = vsyncadd (%p2860_p5), [#allocation11], 4294967024 }
  0xac   : > { %2282 = dma.done.wait (%p2861_p0), [#allocation14], 272   ;;  %p2862_p4 = pmov %p2861_p0 }
  0xad   : > { %p2863_p8 = pmov %p2861_p0 }
  0xae   : > { %2284 = vsyncadd (%p2862_p4), [#allocation14], 4294967024 }
  0xaf   : > { %2286 = dma.done.wait (%p2863_p8), [#allocation17], 272   ;;  %p2864_p9 = pmov %p2861_p0 }
  0xb0   : > { %v2328_v0 = vmov 0.0   ;;  %vm2329_vm0 = vmmov 0   ;;  %v1955_v1 = vld [vmem:[#allocation13 + $0x8] sm:$0xff]   ;;  %v1956_v2 = vld [vmem:[#allocation13] sm:$0xff]   ;;  %v1957_v3 = vld [vmem:[#allocation10 + $0x8] sm:$0xff]   ;;  %vm601_vm1 = vcmask 261120  }
  0xb1   : > { %2288 = vsyncadd (%p2864_p9), [#allocation17], 4294967024  ;;  %1719 = vmatprep.subr.bf16.mxu0 %v2328_v0  ;;  %1723 = vmatprep.mubr.msk.bf16.mxu0 %vm2329_vm0, %v2328_v0  ;;  %v1958_v4 = vld [vmem:[#allocation10] sm:$0xff]   ;;  %v576_v5 = vld [vmem:[%s489_s24] sm:$0xf]  ;;  %vm712_vm2 = vcmask 257024  }
  0xb2   : > { %1727 = vmatprep.subr.bf16.mxu1 %v2328_v0  ;;  %1731 = vmatprep.mubr.msk.bf16.mxu1 %vm2329_vm0, %v2328_v0  ;;  %v1959_v6 = vld [vmem:[#allocation16 + $0x8] sm:$0xff]   ;;  %v1960_v8 = vld [vmem:[#allocation16] sm:$0xff]   ;;  %v716_v9 = vld [vmem:[%s498_s27] sm:$0xf]  ;;  %vm791_vm3 = vcmask 64512   ;;  %s2330_s23 = smov 120  }
  0xb3   : > { %1720 = vmatpush3.bf16.msra.mxu0 %v1955_v1  ;;  %1728 = vmatpush3.bf16.msra.mxu1 %v1957_v3  ;;  %v577_v7 = vld [vmem:[%s480_s15] sm:$0xf]  ;;  %v1655_v10 = vld [vmem:[#allocation15] ss:$0 sm:$0xff]  ;;  %v1659_v13 = vld [vmem:[#allocation12] ss:$0 sm:$0xff] }
  0xb4   : > { %1721 = vmatprep.subr.bf16.mxu0 %v2328_v0  ;;  %1729 = vmatprep.subr.bf16.mxu1 %v2328_v0  ;;  %v1663_v23 = vld [vmem:[#allocation18] ss:$0 sm:$0xff]  ;;  %s2331_s12 = smov 112   ;;  %vm852_vm4 = vcmask 1043456   ;;  %s2332_s29 = smov 104  }
  0xb5   : > { %v787_v61 = vld [vmem:[%s2810_s9] sm:$0xf]  ;;  %v788_v3 = vld [vmem:[%s2810_s9 + $0x4] sm:$0xf]  ;;  %s1654_s30 = sshll.u32 %s2587_s7, 3  ;;  %s2865_s15 = sld [smem:[#allocation30_spill]] }
  0xb6   : > { %s1683_s5 = sshll.u32 %s2307_s20, 7  ;;  %s570_s21 = scalar_lea.vmem [#allocation19], %s1654_s30 }
  0xb7   : > { %1722 = vmatpush3.bf16.msra.mxu0 %v1956_v2  ;;  %1730 = vmatpush3.bf16.msra.mxu1 %v1958_v4  ;;  %v1066_v2 = vsel %vm852_vm4, %v787_v61, 0  ;;  %v1020_v4 = vsel %vm852_vm4, %v788_v3, 0  ;;  %s1448_s24 = sshll.u32 %s570_s21, 4  ;;  %s1434_s20 = scalar_lea.sflag [#allocation6], %s2587_s7  ;;  %s2754_s24 = int_to_ptr.vmem [resolvable:$true] %s1448_s24 }
  0xb8   : > { %1735 = vmatprep.subr.bf16.mxu0 %v2328_v0  ;;  %1743 = vmatprep.subr.bf16.mxu1 %v2328_v0  ;;  %s2219_s13 = scalar_lea.vmem %s2754_s24, 128  ;;  %s2333_s26 = smov [#allocation19]  }
  0xb9   : > { %p2220_p1 = scmp.ne.s32.totalorder %s2754_s24, %s2219_s13  ;;  %s2223_s14 = sshll.u32 %s2333_s26, 4  ;;  %s2224_s14 = int_to_ptr.vmem [resolvable:$false] %s2223_s14 }
  0xba   : > { %1724 = vmatmul.mubr.msk.bf16.vlgmr.msra.gmra.mxu0 %vm601_vm1, %v576_v5  ;;  %1732 = vmatmul.mubr.msk.bf16.vlgmr.msra.gmra.mxu1 %vm601_vm1, %v577_v7  ;;  %s2225_s25 = scalar_lea.vmem %s2224_s14, 256  ;;  %p2226_p13 = scmp.lt.s32.totalorder %s2754_s24, %s2224_s14 }
  0xbb   : > { %1736 = vmatpush3.bf16.msra.mxu0 %v1959_v6  ;;  %1739 = vmatprep.mubr.msk.bf16.mxu0 %vm2329_vm0, %v2328_v0  ;;  %p2867_p12 = scmp.ne.s32.totalorder %s2865_s15, 0  ;;  %p2227_p6 = scmp.lt.s32.totalorder %s2225_s25, %s2219_s13 }
  0xbc   : > { %1737 = vmatprep.subr.bf16.mxu0 %v2328_v0  ;;  %1745 = vmatprep.mubr.msk.bf16.mxu1 %vm2329_vm0, %v2328_v0 }
  0xbd   : > { %p2221_p10 = pnand %p2220_p1, %p2867_p12  ;;  %p2228_p2 = por %p2227_p6, %p2226_p13 }
  0xbf   : > { %1738 = vmatpush3.bf16.msra.mxu0 %v1960_v8  ;;  %p2222_p7 = pneg %p2221_p10 }
  0xc0   : > { %1749 = vmatprep.subr.bf16.mxu0 %v2328_v0 }
  0xc1   : > { %p2229_p11 = pnand %p2228_p2, %p2222_p7 }
  0xc2   : > { %1740 = vmatmul.mubr.msk.bf16.vlgmr.msra.gmra.mxu0 %vm601_vm1, %v716_v9 }
  0xc3   : > { %1751 = vmatprep.mubr.msk.bf16.mxu0 %vm2329_vm0, %v2328_v0 }
 0x17a   : > { %v639_v11 = vpop.f32.mrf.mxu0  ;;  %v705_v16 = vpop.f32.mrf.mxu1 }
 0x17b   : > { %v640_v12 = vadd.f32 %v1655_v10, %v639_v11  ;;  %v706_v18 = vadd.f32 %v1659_v13, %v705_v16 }
 0x17c   : > { %v1725_v14 = vpop.f32.mrf.mxu0  ;;  %v1733_v19 = vpop.f32.mrf.mxu1 }
 0x17d   : > { %v711_v15 = vpack.c.bf16 %v640_v12, %v640_v12  ;;  %v714_v21 = vpack.c.bf16 %v706_v18, %v706_v18 }
 0x17e   : > { %v642_v17 = vpop.f32.mrf.mxu0  ;;  %v708_v22 = vpop.f32.mrf.mxu1 }
 0x17f   : > { %713 = vst.msk [vmem:[#allocation2] sm:$0xf] %vm712_vm2, %v711_v15  ;;  %715 = vst.msk [vmem:[#allocation3] sm:$0xf] %vm712_vm2, %v714_v21 }
 0x180   : > { %v1726_v20 = vpop.f32.mrf.mxu0  ;;  %v1734_v25 = vpop.f32.mrf.mxu1 }
 0x182   : > { %v778_v24 = vpop.f32.mrf.mxu0 }
 0x183   : > { %v779_v27 = vadd.f32 %v1663_v23, %v778_v24 }
 0x184   : > { %v1741_v26 = vpop.f32.mrf.mxu0 }
 0x185   : > { %v2645_v33 = vpack.c.bf16 %v779_v27, %v779_v27 }
 0x186   : > { %v785_v28 = vld [vmem:[#allocation2] sm:$0xf]  ;;  %v781_v29 = vpop.f32.mrf.mxu0  ;;  %v786_v34 = vld [vmem:[#allocation3] sm:$0xf] }
 0x187   : > { %v796_v30 = vsel %vm791_vm3, %v785_v28, 0  ;;  %v2643_v31 = vcombine.low %v785_v28, %v785_v28  ;;  %v2650_v35 = vcombine.low %v786_v34, %v786_v34  ;;  %v854_v36 = vsel %vm852_vm4, %v786_v34, 0 }
 0x188   : > { %1744 = vmatpush3.bf16.xpose.msra.mxu1 %v796_v30  ;;  %v1742_v32 = vpop.f32.mrf.mxu0  ;;  %1750 = vmatpush3.bf16.msra.mxu0 %v854_v36 }
 0x189   : > { %904 = vrot.lane.b32.xlu0 %v2643_v31, %s2330_s23  ;;  %1755 = vmatprep.subr.bf16.mxu1 %v2328_v0 }
 0x18a   : > { %1761 = vmatprep.subr.bf16.mxu0 %v2328_v0 }
 0x18d   : > { %899 = vrot.lane.b32.xlu0 %v2645_v33, %s2330_s23 }
 0x18f   : > { %1746 = vmatmul.mubr.msk.bf16.vlgmr.msra.gmra.mxu1 %vm791_vm3, %v2645_v33 }
 0x190   : > { %1757 = vmatprep.mubr.msk.bf16.mxu1 %vm2329_vm0, %v2328_v0 }
 0x191   : > { %966 = vrot.lane.b32.xlu0 %v2650_v35, %s2330_s23 }
 0x195   : > { %1110 = vrot.lane.b32.xlu0 %v2643_v31, %s2331_s12 }
 0x1fb   : > { %v905_v37 = vpop.permute.xlu0 %904 }
 0x1fc   : > { %v910_v38 = vsel %vm791_vm3, %v905_v37, 0 }
 0x1fd   : > { %1756 = vmatpush3.bf16.xpose.msra.mxu1 %v910_v38 }
 0x1fe   : > { %1767 = vmatprep.subr.bf16.mxu1 %v2328_v0 }
 0x1ff   : > { %v900_v39 = vpop.permute.xlu0 %899 }
 0x203   : > { %v967_v54 = vpop.permute.xlu0 %966 }
 0x204   : > { %1758 = vmatmul.mubr.msk.bf16.vlgmr.msra.gmra.mxu1 %vm791_vm3, %v900_v39  ;;  %v972_v55 = vsel %vm852_vm4, %v967_v54, 0 }
 0x205   : > { %1769 = vmatprep.mubr.msk.bf16.mxu1 %vm2329_vm0, %v2328_v0  ;;  %1768 = vmatpush3.bf16.msra.mxu1 %v1020_v4 }
 0x206   : > { %1779 = vmatprep.subr.bf16.mxu1 %v2328_v0 }
 0x207   : > { %v1111_v5 = vpop.permute.xlu0 %1110 }
 0x208   : > { %v1116_v23 = vsel %vm791_vm3, %v1111_v5, 0 }
 0x24f   : > { %v832_v40 = vpop.f32.mrf.mxu1 }
 0x250   : > { %v838_v41 = vsel %vm791_vm3, %v832_v40, -inf }
 0x251   : > { %839 = vmax.xlane.f32.xlu1 %v838_v41  ;;  %v1747_v42 = vpop.f32.mrf.mxu1 }
 0x253   : > { %v835_v43 = vpop.f32.mrf.mxu1 }
 0x255   : > { %v1748_v44 = vpop.f32.mrf.mxu1 }
 0x2c4   : > { %v946_v45 = vpop.f32.mrf.mxu1 }
 0x2c5   : > { %v952_v46 = vsel %vm791_vm3, %v946_v45, -inf }
 0x2c6   : > { %953 = vmax.xlane.f32.xlu1 %v952_v46  ;;  %v1759_v47 = vpop.f32.mrf.mxu1 }
 0x2c8   : > { %v949_v48 = vpop.f32.mrf.mxu1 }
 0x2ca   : > { %v1760_v49 = vpop.f32.mrf.mxu1 }
 0x2cb   : > { %v789_v49 = vld [vmem:[%s2810_s9 + $0x8] sm:$0xf] }
 0x2da   : > { %v840_v50 = vpop.xlane.xlu1 %839 }
 0x2db   : > { %v841_v51 = vsub.f32 %v832_v40, %v840_v50  ;;  %v1223_v50 = vsel %vm852_vm4, %v789_v49, 0 }
 0x2dd   : > { %v842_v52 = vmul.f32 1.442695, %v841_v51 }
 0x2df   : > { %1963 = vpow2.f32 %v842_v52 }
 0x2ec   : > { %v1964_v53 = vpop.eup %1963 }
 0x2ed   : > { %v844_v56 = vsel %vm791_vm3, %v1964_v53, 0.0  ;;  %v848_v57 = vpack.c.bf16 %v1964_v53, %v1964_v53 }
 0x2ee   : > { %845 = vadd.xlane.f32.xlu0 %v844_v56 }
 0x2ef   : > { %1752 = vmatmul.mubr.msk.bf16.vlgmr.msra.gmra.mxu0 %vm791_vm3, %v848_v57 }
 0x2f0   : > { %1762 = vmatpush3.bf16.msra.mxu0 %v972_v55  ;;  %1763 = vmatprep.mubr.msk.bf16.mxu0 %vm2329_vm0, %v2328_v0 }
 0x2f1   : > { %1773 = vmatprep.subr.bf16.mxu0 %v2328_v0 }
 0x304   : > { %1169 = vrot.lane.b32.xlu0 %v2650_v35, %s2331_s12 }
 0x308   : > { %1266 = vrot.lane.b32.xlu0 %v2645_v33, %s2332_s29 }
 0x34f   : > { %v954_v58 = vpop.xlane.xlu1 %953 }
 0x350   : > { %v955_v59 = vsub.f32 %v946_v45, %v954_v58 }
 0x352   : > { %v956_v60 = vmul.f32 1.442695, %v955_v59 }
 0x354   : > { %1965 = vpow2.f32 %v956_v60 }
 0x361   : > { %v1966_v62 = vpop.eup %1965 }
 0x362   : > { %v958_v63 = vsel %vm791_vm3, %v1966_v62, 0.0  ;;  %v962_v1 = vpack.c.bf16 %v1966_v62, %v1966_v62 }
 0x363   : > { %959 = vadd.xlane.f32.xlu1 %v958_v63 }
 0x364   : > { %1764 = vmatmul.mubr.msk.bf16.vlgmr.msra.gmra.mxu0 %vm791_vm3, %v962_v1 }
 0x365   : > { %1774 = vmatpush3.bf16.msra.mxu0 %v1066_v2  ;;  %1775 = vmatprep.mubr.msk.bf16.mxu0 %vm2329_vm0, %v2328_v0 }
 0x366   : > { %1785 = vmatprep.subr.bf16.mxu0 %v2328_v0 }
 0x374   : > { %1108 = vrot.lane.b32.xlu1 %v2645_v33, %s2331_s12  ;;  %s2866_s12 = sld [smem:[#allocation36_spill]] }
 0x377   : > { %v846_v6 = vpop.xlane.xlu0 %845 }
 0x378   : > { %1967 = vrcp.f32 %v846_v6 }
 0x37b   : > { %v1170_v10 = vpop.permute.xlu0 %1169 }
 0x37c   : > { %v1175_v14 = vsel %vm852_vm4, %v1170_v10, 0 }
 0x385   : > { %v1968_v7 = vpop.eup %1967 }
 0x3af   : > { %v890_v8 = vpop.f32.mrf.mxu0 }
 0x3b0   : > { %v896_v9 = vmul.f32 %v1968_v7, %v890_v8 }
 0x3b1   : > { %v1753_v11 = vpop.f32.mrf.mxu0 }
 0x3b2   : > { %v897_v12 = vpack.c.bf16 %v896_v9, %v896_v9 }
 0x3b3   : > { %v893_v13 = vpop.f32.mrf.mxu0 }
 0x3b4   : > { %1776 = vmatmul.mubr.msk.bf16.vlgmr.msra.gmra.mxu0 %vm791_vm3, %v897_v12 }
 0x3b5   : > { %1786 = vmatpush3.bf16.msra.mxu0 %v1175_v14  ;;  %v1754_v15 = vpop.f32.mrf.mxu0  ;;  %1787 = vmatprep.mubr.msk.bf16.mxu0 %vm2329_vm0, %v2328_v0 }
 0x3b6   : > { %1797 = vmatprep.subr.bf16.mxu0 %v2328_v0 }
 0x3ec   : > { %v960_v16 = vpop.xlane.xlu1 %959 }
 0x3ed   : > { %1969 = vrcp.f32 %v960_v16 }
 0x3f0   : > { %v1109_v25 = vpop.permute.xlu1 %1108 }
 0x3fa   : > { %v1970_v17 = vpop.eup %1969 }
 0x424   : > { %v1008_v18 = vpop.f32.mrf.mxu0 }
 0x425   : > { %v1014_v19 = vmul.f32 %v1970_v17, %v1008_v18 }
 0x426   : > { %v1765_v20 = vpop.f32.mrf.mxu0 }
 0x427   : > { %v1015_v21 = vpack.c.bf16 %v1014_v19, %v1014_v19 }
 0x428   : > { %v1011_v22 = vpop.f32.mrf.mxu0 }
 0x429   : > { %1770 = vmatmul.mubr.msk.bf16.vlgmr.msra.gmra.mxu1 %vm791_vm3, %v1015_v21 }
 0x42a   : > { %1780 = vmatpush3.bf16.xpose.msra.mxu1 %v1116_v23  ;;  %v1766_v24 = vpop.f32.mrf.mxu0  ;;  %1781 = vmatprep.mubr.msk.bf16.mxu1 %vm2329_vm0, %v2328_v0 }
 0x42b   : > { %1791 = vmatprep.subr.bf16.mxu1 %v2328_v0  ;;  %v1681_v24 = vld [vmem:[%s2811_s10] ss:$0 sm:$0xff] }
 0x431   : > { %1782 = vmatmul.mubr.msk.bf16.vlgmr.msra.gmra.mxu1 %vm791_vm3, %v1109_v25 }
 0x432   : > { %1793 = vmatprep.mubr.msk.bf16.mxu1 %vm2329_vm0, %v2328_v0  ;;  %1792 = vmatpush3.bf16.msra.mxu1 %v1223_v50 }
 0x433   : > { %1803 = vmatprep.subr.bf16.mxu1 %v2328_v0 }
 0x474   : > { %v2707_v26 = vpop.f32.mrf.mxu0 }
 0x476   : > { %v1777_v27 = vpop.f32.mrf.mxu0 }
 0x478   : > { %v1105_v28 = vpop.f32.mrf.mxu0 }
 0x47a   : > { %v1778_v29 = vpop.f32.mrf.mxu0 }
 0x4e9   : > { %v2709_v30 = vpop.f32.mrf.mxu1 }
 0x4ea   : > { %v1103_v9 = vadd.f32 %v2707_v26, %v2709_v30 }
 0x4eb   : > { %v1771_v32 = vpop.f32.mrf.mxu1 }
 0x4ed   : > { %v1059_v33 = vpop.f32.mrf.mxu1 }
 0x4ef   : > { %v1772_v34 = vpop.f32.mrf.mxu1 }
 0x4f1   : > { %v1152_v36 = vpop.f32.mrf.mxu1 }
 0x4f2   : > { %v1158_v37 = vsel %vm791_vm3, %v1152_v36, -inf }
 0x4f3   : > { %1159 = vmax.xlane.f32.xlu1 %v1158_v37  ;;  %v1783_v38 = vpop.f32.mrf.mxu1 }
 0x4f5   : > { %v1155_v39 = vpop.f32.mrf.mxu1 }
 0x4f7   : > { %v1784_v40 = vpop.f32.mrf.mxu1 }
 0x504   : > { %1268 = vrot.lane.b32.xlu1 %v2643_v31, %s2332_s29  ;;  %v1267_v31 = vpop.permute.xlu0 %1266 }
 0x57c   : > { %v1160_v41 = vpop.xlane.xlu1 %1159 }
 0x57d   : > { %v1161_v42 = vsub.f32 %v1152_v36, %v1160_v41 }
 0x57f   : > { %v1162_v43 = vmul.f32 1.442695, %v1161_v42 }
 0x580   : > { %v1269_v45 = vpop.permute.xlu1 %1268 }
 0x581   : > { %1971 = vpow2.f32 %v1162_v43  ;;  %v1274_v48 = vsel %vm791_vm3, %v1269_v45, 0 }
 0x58e   : > { %v1972_v44 = vpop.eup %1971 }
 0x58f   : > { %v1164_v46 = vsel %vm791_vm3, %v1972_v44, 0.0  ;;  %v1168_v47 = vpack.c.bf16 %v1972_v44, %v1972_v44 }
 0x590   : > { %1165 = vadd.xlane.f32.xlu0 %v1164_v46 }
 0x591   : > { %1788 = vmatmul.mubr.msk.bf16.vlgmr.msra.gmra.mxu0 %vm791_vm3, %v1168_v47 }
 0x592   : > { %1798 = vmatpush3.bf16.xpose.msra.mxu0 %v1274_v48  ;;  %1799 = vmatprep.mubr.msk.bf16.mxu0 %vm2329_vm0, %v2328_v0 }
 0x593   : > { %1809 = vmatprep.subr.bf16.mxu0 %v2328_v0 }
 0x599   : > { %1800 = vmatmul.mubr.msk.bf16.vlgmr.msra.gmra.mxu0 %vm791_vm3, %v1267_v31 }
 0x59a   : > { %1811 = vmatprep.mubr.msk.bf16.mxu0 %vm2329_vm0, %v2328_v0 }
 0x5a6   : > { %1327 = vrot.lane.b32.xlu0 %v2650_v35, %s2332_s29  ;;  %s2752_s29 = scalar_lea.hbm %s2866_s12, %s1683_s5 }
 0x619   : > { %v1166_v51 = vpop.xlane.xlu0 %1165 }
 0x61a   : > { %1973 = vrcp.f32 %v1166_v51 }
 0x61d   : > { %v1328_v55 = vpop.permute.xlu0 %1327 }
 0x61e   : > { %v1333_v35 = vsel %vm852_vm4, %v1328_v55, 0 }
 0x627   : > { %v1974_v52 = vpop.eup %1973 }
 0x651   : > { %v1211_v53 = vpop.f32.mrf.mxu0 }
 0x652   : > { %v1217_v54 = vmul.f32 %v1974_v52, %v1211_v53 }
 0x653   : > { %v1789_v56 = vpop.f32.mrf.mxu0 }
 0x654   : > { %v1218_v57 = vpack.c.bf16 %v1217_v54, %v1217_v54 }
 0x655   : > { %v1214_v58 = vpop.f32.mrf.mxu0 }
 0x656   : > { %1794 = vmatmul.mubr.msk.bf16.vlgmr.msra.gmra.mxu1 %vm791_vm3, %v1218_v57 }
 0x657   : > { %1804 = vmatpush3.bf16.msra.mxu1 %v1333_v35  ;;  %v1790_v59 = vpop.f32.mrf.mxu0  ;;  %1805 = vmatprep.mubr.msk.bf16.mxu1 %vm2329_vm0, %v2328_v0  ;;  %v790_v0 = vld [vmem:[%s2810_s9 + $0xc] sm:$0xf] }
 0x658   : > { %v1381_v8 = vsel %vm852_vm4, %v790_v0, 0 }
 0x659   : > { %v1310_v60 = vpop.f32.mrf.mxu0  ;;  %1810 = vmatpush3.bf16.msra.mxu0 %v1381_v8 }
 0x65a   : > { %v1316_v61 = vsel %vm791_vm3, %v1310_v60, -inf }
 0x65b   : > { %1317 = vmax.xlane.f32.xlu1 %v1316_v61  ;;  %v1801_v62 = vpop.f32.mrf.mxu0 }
 0x65d   : > { %v1313_v63 = vpop.f32.mrf.mxu0 }
 0x65f   : > { %v1802_v1 = vpop.f32.mrf.mxu0 }
 0x6e4   : > { %v1318_v2 = vpop.xlane.xlu1 %1317 }
 0x6e5   : > { %v1319_v3 = vsub.f32 %v1310_v60, %v1318_v2 }
 0x6e7   : > { %v1320_v4 = vmul.f32 1.442695, %v1319_v3 }
 0x6e9   : > { %1975 = vpow2.f32 %v1320_v4 }
 0x6f6   : > { %v1976_v5 = vpop.eup %1975 }
 0x6f7   : > { %v1322_v6 = vsel %vm791_vm3, %v1976_v5, 0.0  ;;  %v1326_v7 = vpack.c.bf16 %v1976_v5, %v1976_v5 }
 0x6f8   : > { %1323 = vadd.xlane.f32.xlu1 %v1322_v6 }
 0x6f9   : > { %1806 = vmatmul.mubr.msk.bf16.vlgmr.msra.gmra.mxu1 %vm791_vm3, %v1326_v7 }
 0x716   : > { %v1259_v10 = vpop.f32.mrf.mxu1 }
 0x717   : > { %v1265_v11 = vadd.f32 %v1259_v10, %v1103_v9 }
 0x718   : > { %v1795_v12 = vpop.f32.mrf.mxu1 }
 0x71a   : > { %v1262_v13 = vpop.f32.mrf.mxu1 }
 0x71c   : > { %v1796_v14 = vpop.f32.mrf.mxu1 }
 0x781   : > { %v1324_v15 = vpop.xlane.xlu1 %1323 }
 0x782   : > { %1977 = vrcp.f32 %v1324_v15 }
 0x78f   : > { %v1978_v16 = vpop.eup %1977 }
 0x7b9   : > { %v1369_v17 = vpop.f32.mrf.mxu1 }
 0x7ba   : > { %v1375_v18 = vmul.f32 %v1978_v16, %v1369_v17 }
 0x7bb   : > { %v1807_v19 = vpop.f32.mrf.mxu1 }
 0x7bc   : > { %v1376_v20 = vpack.c.bf16 %v1375_v18, %v1375_v18 }
 0x7bd   : > { %v1372_v21 = vpop.f32.mrf.mxu1 }
 0x7be   : > { %1812 = vmatmul.mubr.msk.bf16.vlgmr.msra.gmra.mxu0 %vm791_vm3, %v1376_v20 }
 0x7bf   : > { %v1808_v22 = vpop.f32.mrf.mxu1 }
 0x87e   : > { %v1417_v23 = vpop.f32.mrf.mxu0 }
 0x87f   : > { %v1423_v25 = vadd.f32 %v1417_v23, %v1265_v11 }
 0x880   : > { %v1813_v26 = vpop.f32.mrf.mxu0 }
 0x881   : > { %v1431_v27 = vadd.f32 %v1681_v24, %v1423_v25 }
 0x882   : > { %v1420_v28 = vpop.f32.mrf.mxu0 }
 0x883   : > { %1432 = vst.msk [vmem:[%s570_s21] sm:$0xff] %vm601_vm1, %v1431_v27 }
 0x884   : > { %v1814_v29 = vpop.f32.mrf.mxu0 }
 0x885   : > { %2232 = shalt.err (!%p2229_p11)
}
 0x886   : > { %s2233_s17 = scalar_lea.hbm %s2752_s29, 128  ;;  %s2237_s16 = scalar_lea.hbm %s2866_s12, 256 }
 0x887   : > { %p2234_p3 = scmp.ne.s32.totalorder %s2752_s29, %s2233_s17  ;;  %p2238_p4 = scmp.lt.s32.totalorder %s2752_s29, %s2866_s12 }
 0x888   : > { %p2239_p8 = scmp.lt.s32.totalorder %s2237_s16, %s2233_s17 }
 0x889   : > { %p2235_p5 = pnand %p2234_p3, %p2867_p12 }
 0x88a   : > { %p2240_p9 = por %p2239_p8, %p2238_p4 }
 0x88b   : > { %p2236_p0 = pneg %p2235_p5 }
 0x88d   : > { %p2241_p1 = pnand %p2240_p9, %p2236_p0 }
 0x88f   : > { %2244 = shalt.err (!%p2241_p1)
}
 0x890   : > { %1845 = dma.vmem_to_hbm [thread:$0]  (%p2867_p12), %s2754_s24, 128, %s2752_s29, %s1434_s20  }
 0x891 PF: > { %s2868_s22 = sld [smem:[#allocation26_spill]] }
 0x892   : > { %s2869_s11 = sld [smem:[#allocation32_spill]] }
 0x893   : > { %s2870_s5 = sld [smem:[#allocation28_spill]] }
 0x897   : > { %s1460_s21 = sand.u32 1, %s2868_s22  }
 0x898   : > { %p2871_p10 = scmp.ne.s32.totalorder %s2869_s11, 0  ;;  %s1461_s27 = scalar_lea.sflag [#allocation6], %s1460_s21 }
 0x899   : > { %p2872_p7 = scmp.ge.s32.totalorder %s2870_s5, 2 }
 0x89b   : > { %p1877_p13 = pnand %p2872_p7, %p2871_p10 }
 0x89d   : > { %p1878_p6 = pneg %p1877_p13 }
 0x89f   : > { %2290 = dma.done.wait (%p1878_p6), %s1461_s27, 128  }
 0x8a0   : > { %2292 = vsyncadd (%p1878_p6), %s1461_s27, 4294967168  ;;  %s33_s22 = sadd.s32 1, %s2870_s5   ;;  %s2873_s15 = sld [smem:[#allocation31_spill]] }
 0x8a1   : > { %p30_p2 = scmp.ge.s32.totalorder %s33_s22, 4   ;;  %s2874_s20 = sld [smem:[#allocation27_spill]] }
 0x8a2   : > { %s2875_s21 = sld [smem:[#allocation29_spill]]  ;;  %s2876_s17 = smov %s2299_s18 }
 0x8a3   : > { %s2877_s18 = smov %s2303_s19  ;;  %32 = sbr.rel (!%p30_p2) target bundleno = 16 (0x10), region = 161 }
 0x8a6   : > { %s2878_s19 = smov %s2873_s15 }
 0x8a8   :  { %1466 = vsyncpa [#allocation5], 1 }
 0x8a9   :  { %1468 = vsyncpa [#allocation5 + $0x1], 1 }
 0x8aa   :  { %1469 = vsyncpa [#allocation8], 1 }
 0x8ab   :  { %1471 = vsyncpa [#allocation8 + $0x1], 1 }
 0x8ac   :  { %1472 = vsyncpa [#allocation11], 1 }
 0x8ad   :  { %1473 = vsyncpa [#allocation14], 1 }
 0x8ae   :  { %1474 = vsyncpa [#allocation17], 1 }
 0x8af   :  { %1475 = vsyncpa [#allocation6], 1 }
 0x8b0   :  { %1477 = vsyncpa [#allocation6 + $0x1], 1 }

</bundles_post_ra>
